<compile_context>
chip_gen: v7x
topology: tpu7x:2x2x1
jax: 0.10.0
libtpu: 0.0.40
codegen_flags: <defaults>
</compile_context>

<pallas_src>
import functools

import jax
import jax.numpy as jnp
from jax.experimental import pallas as pl
from jax.experimental.pallas import tpu as pltpu


def _sigmoid(x):
    # Explicit logistic: no NaNs for large |x| and guaranteed Mosaic lowering.
    return 1.0 / (1.0 + jnp.exp(-x))


def _lse_over_k(s):
    m = jnp.max(s, axis=0, keepdims=True)
    return m + jnp.log(jnp.sum(jnp.exp(s - m), axis=0, keepdims=True))


def _jrc_kernel(*refs, alpha, num_positive, non_sigmoid, packed, emit_aux):
    # ---- unpack refs (static Python branching on packed / emit_aux) ----
    if packed:
        x_ref, valid_ref = refs[:2]
        out_refs = refs[2:]
        # bf16 channels packed in a u32 lane: ch0 = low 16 bits, ch1 = high.
        # bf16 -> f32 upcast is just "put the bf16 bits in the high half".
        x = x_ref[...]
        s0 = pltpu.bitcast(x << jnp.uint32(16), jnp.float32)
        s1 = pltpu.bitcast(x & jnp.uint32(0xFFFF0000), jnp.float32)
    else:
        s0_ref, s1_ref, valid_ref = refs[:3]
        out_refs = refs[3:]
        s0 = s0_ref[...].astype(jnp.float32)   # upcast in VMEM
        s1 = s1_ref[...].astype(jnp.float32)

    if emit_aux:
        rm_ref, calib_ref, rank_ref, stats_ref = out_refs
    else:
        rm_ref, stats_ref = out_refs

    v = valid_ref[...].astype(jnp.float32)

    if not non_sigmoid:
        s0 = _sigmoid(s0)
        s1 = _sigmoid(s1)

    K = s0.shape[0]
    P = num_positive  # Python int -> all channel-selection logic is static

    # The 2-channel softmax collapses onto d = s1 - s0 with one shared exp.
    d = s1 - s0
    a = jnp.exp(-jnp.abs(d))        # single shared transcendental per element
    log1pa = jnp.log(1.0 + a)       # softplus tail (a in (0, 1])

    if 0 < P < K:
        # [K, 1] mask; a select per element instead of sublane slice+concat.
        row_is_pos = jax.lax.broadcasted_iota(jnp.int32, (K, 1), 0) < P

    # ---- calibration loss: -log softmax_ch[sel] = softplus(s_other - s_sel) --
    if P == 0:
        loss_calib = jnp.maximum(d, 0.0) + log1pa
    elif P == K:
        loss_calib = jnp.maximum(-d, 0.0) + log1pa
    else:
        loss_calib = jnp.maximum(jnp.where(row_is_pos, -d, d), 0.0) + log1pa

    # ---- rank loss: -log softmax_K[sel] per channel (sublane LSE over K) ----
    if P == 0:
        loss_rank = _lse_over_k(s0) - s0
    elif P == K:
        loss_rank = _lse_over_k(s1) - s1
    else:
        loss_rank = jnp.where(row_is_pos,
                              _lse_over_k(s1) - s1,
                              _lse_over_k(s0) - s0)

    rm = v * (alpha * loss_calib + (1.0 - alpha) * loss_rank)

    rm_ref[...] = rm.astype(rm_ref.dtype)
    if emit_aux:
        calib_ref[...] = loss_calib.astype(calib_ref.dtype)
        rank_ref[...] = loss_rank.astype(rank_ref.dtype)

    # ---- stats: softmax_ch(score)[..., 1] == sigmoid(d); sigmoid is monotone
    # so reduce d over K first, then apply sigmoid on [1, tn] only.
    d_max = jnp.max(d, axis=0, keepdims=True)
    d_min = jnp.min(d, axis=0, keepdims=True)
    stats = jnp.concatenate([_sigmoid(d_max), _sigmoid(d_min)], axis=0)
    stats_ref[...] = stats.astype(stats_ref.dtype)


def jrc_loss(score, valid, num_positive, alpha=0.75, non_sigmoid=True,
             loss_dtype=jnp.float32, emit_aux=True):
    """Pallas implementation of JRCLoss.forward.

    score: [K, B, T, 2] (f32 or bf16), valid: [K, B, T], num_positive: python int.
    loss_dtype: dtype of the loss maps (bf16 halves output HBM bytes if the
    consumer tolerates it; stats stay f32).
    emit_aux=False skips the calib/rank maps (cuts output traffic by ~2/3).
    """
    K, B, T, C = score.shape
    assert C == 2, "last dim of score must be 2"
    N = B * T

    # ---- tile selection: lane-aligned tiles <= 2048, >= 8 pipelined steps
    # when N permits, ragged last block (no pad / no un-pad slice), and a
    # VMEM clamp on K * tn for large-K configs (v7x scoped default = 32 MiB).
    LANE = 128
    MAX_TN = 2048
    if N <= LANE:
        tn = N                                     # single block == full array
    else:
        steps = max(8, pl.cdiv(N, MAX_TN))         # deep pipeline
        tn = pl.cdiv(pl.cdiv(N, steps), LANE) * LANE
        vmem_budget = 24 * 1024 * 1024             # headroom under 32 MiB scoped
        tn_cap = max(LANE, (vmem_budget // (80 * K)) // LANE * LANE)
        tn = max(LANE, min(tn, MAX_TN, (N // LANE) * LANE, tn_cap))
    grid = (pl.cdiv(N, tn),)

    v = valid.reshape(K, N)
    if v.dtype == jnp.bool_:
        v = v.astype(jnp.int8)                     # stay narrow; f32 cast in VMEM

    s_r = score.reshape(K, N, 2)
    packed = score.dtype == jnp.bfloat16
    if packed:
        # Free reinterpret of the interleaved channels: ch0 -> low 16 bits,
        # ch1 -> high 16 bits of each u32 lane.  No extra HBM pass.
        score_in = (jax.lax.bitcast_convert_type(s_r, jnp.uint32),)
    else:
        # One fused XLA slice pass (see TODO at top of file).
        score_in = (s_r[..., 0], s_r[..., 1])

    kernel = functools.partial(
        _jrc_kernel, alpha=float(alpha), num_positive=int(num_positive),
        non_sigmoid=bool(non_sigmoid), packed=packed, emit_aux=bool(emit_aux))

    spec_kn = pl.BlockSpec((K, tn), lambda j: (0, j))
    spec_2n = pl.BlockSpec((2, tn), lambda j: (0, j))

    out_shape = [jax.ShapeDtypeStruct((K, N), loss_dtype)]       # rm
    out_specs = [spec_kn]
    if emit_aux:
        out_shape += [jax.ShapeDtypeStruct((K, N), loss_dtype),  # calib
                      jax.ShapeDtypeStruct((K, N), loss_dtype)]  # rank
        out_specs += [spec_kn, spec_kn]
    out_shape.append(jax.ShapeDtypeStruct((2, N), jnp.float32))  # smax/smin
    out_specs.append(spec_2n)

    outs = pl.pallas_call(
        kernel,
        out_shape=tuple(out_shape),
        grid_spec=pltpu.PrefetchScalarGridSpec(
            num_scalar_prefetch=0,
            grid=grid,
            in_specs=[spec_kn] * len(score_in) + [spec_kn],
            out_specs=out_specs,
        ),
        compiler_params=pltpu.CompilerParams(
            dimension_semantics=("parallel",)),
    )(*score_in, v)

    if emit_aux:
        rm, calib, rank, stats = outs
    else:
        rm, stats = outs

    result = {
        'Loss_rm/rm': rm.reshape(K, B, T),
        'Info/score_max': stats[0].reshape(B, T),
        'Info/score_min': stats[1].reshape(B, T),
    }
    if emit_aux:
        result['Loss_rm/calib'] = calib.reshape(K, B, T)
        result['Loss_rm/rank'] = rank.reshape(K, B, T)
    return result


def _jrc_loss_ref(score, valid, num_positive, alpha=0.75, non_sigmoid=True):
    """Pure-JAX reference mirroring the PyTorch module."""
    K = score.shape[0]
    s = score if non_sigmoid else jax.nn.sigmoid(score)
    sel = jnp.concatenate([jnp.ones((num_positive,), jnp.int32),
                           jnp.zeros((K - num_positive,), jnp.int32)])
    sel = sel[:, None, None]                                   # [K,1,1]
    vals_calib = jax.nn.softmax(s, axis=-1)
    vals_rank = jax.nn.softmax(s, axis=0)
    gather = lambda vals: jnp.take_along_axis(
        vals, jnp.broadcast_to(sel[..., None], s.shape[:-1] + (1,)), axis=-1)[..., 0]
    loss_calib = -jnp.log(gather(vals_calib))
    loss_rank = -jnp.log(gather(vals_rank))
    return {
        'Loss_rm/rm': valid * (alpha * loss_calib + (1 - alpha) * loss_rank),
        'Loss_rm/calib': loss_calib,
        'Loss_rm/rank': loss_rank,
        'Info/score_max': vals_calib[..., 1].max(axis=0),
        'Info/score_min': vals_calib[..., 1].min(axis=0),
    }


if __name__ == "__main__":
    key = jax.random.PRNGKey(0)
    k1, k2, k3, k4 = jax.random.split(key, 4)

    def check(out, ref, keys, tag):
        for k in keys:
            ok = jnp.allclose(out[k], ref[k], atol=1e-5, rtol=1e-4)
            assert bool(ok), f"{tag}: mismatch in {k}"

    ALL = ('Loss_rm/rm', 'Loss_rm/calib', 'Loss_rm/rank',
           'Info/score_max', 'Info/score_min')

    # cfg1: f32 score, mixed P, single small block.
    K, B, T, P = 4, 2, 8, 2
    score1 = jax.random.normal(k1, (K, B, T, 2), dtype=jnp.float32)
    valid1 = (jax.random.uniform(k2, (K, B, T)) > 0.2).astype(jnp.float32)
    out1 = jrc_loss(score1, valid1, P, alpha=0.75, non_sigmoid=True)
    out1 = jax.tree_util.tree_map(jax.block_until_ready, out1)
    ref1 = _jrc_loss_ref(score1, valid1, P, alpha=0.75, non_sigmoid=True)
    check(out1, ref1, ALL, "f32/mixed")

    # cfg1b: emit_aux=False path (rm + stats only).
    out1b = jrc_loss(score1, valid1, P, alpha=0.75, non_sigmoid=True,
                     emit_aux=False)
    out1b = jax.tree_util.tree_map(jax.block_until_ready, out1b)
    check(out1b, ref1, ('Loss_rm/rm', 'Info/score_max', 'Info/score_min'),
          "f32/no-aux")

    # cfg2: bf16 score -> packed-u32 in-kernel de-interleave path.
    score_bf = score1.astype(jnp.bfloat16)
    out2 = jrc_loss(score_bf, valid1, P, alpha=0.75, non_sigmoid=True)
    out2 = jax.tree_util.tree_map(jax.block_until_ready, out2)
    ref2 = _jrc_loss_ref(score_bf.astype(jnp.float32), valid1, P,
                         alpha=0.75, non_sigmoid=True)
    check(out2, ref2, ALL, "bf16/packed")

    # cfg3: ragged multi-block grid (N=200), P == K branch, non_sigmoid=False.
    K, B, T, P = 4, 2, 100, 4
    score3 = jax.random.normal(k3, (K, B, T, 2), dtype=jnp.float32)
    valid3 = (jax.random.uniform(k4, (K, B, T)) > 0.2).astype(jnp.float32)
    out3 = jrc_loss(score3, valid3, P, alpha=0.75, non_sigmoid=False)
    out3 = jax.tree_util.tree_map(jax.block_until_ready, out3)
    ref3 = _jrc_loss_ref(score3, valid3, P, alpha=0.75, non_sigmoid=False)
    check(out3, ref3, ALL, "f32/ragged")

    print("KERNEL_OK")
</pallas_src>

<mosaic_0001>
module attributes {stable_mosaic.version = 11 : i64} {
  func.func @_jrc_kernel(%arg0: i32, %arg1: memref<4x16xf32, #tpu.memory_space<vmem>>, %arg2: memref<4x16xf32, #tpu.memory_space<vmem>>, %arg3: memref<4x16xf32, #tpu.memory_space<vmem>>, %arg4: memref<4x16xf32, #tpu.memory_space<vmem>>, %arg5: memref<4x16xf32, #tpu.memory_space<vmem>>, %arg6: memref<4x16xf32, #tpu.memory_space<vmem>>, %arg7: memref<2x16xf32, #tpu.memory_space<vmem>>) attributes {dimension_semantics = [#tpu.dimension_semantics<parallel>], iteration_bounds = array<i64: 1>, scalar_prefetch = 0 : i64, scratch_operands = 0 : i64, tpu.core_type = #tpu.core_type<tc>, window_params = [{transform_indices = @transform_0, window_bounds = array<i64: 4, 16>}, {transform_indices = @transform_1, window_bounds = array<i64: 4, 16>}, {transform_indices = @transform_2, window_bounds = array<i64: 4, 16>}, {transform_indices = @transform_3, window_bounds = array<i64: 4, 16>}, {transform_indices = @transform_4, window_bounds = array<i64: 4, 16>}, {transform_indices = @transform_5, window_bounds = array<i64: 4, 16>}, {transform_indices = @transform_6, window_bounds = array<i64: 2, 16>}]} {
    %c0 = arith.constant 0 : index
    %c0_0 = arith.constant 0 : index
    %0 = vector.load %arg1[%c0, %c0_0] : memref<4x16xf32, #tpu.memory_space<vmem>>, vector<4x16xf32>
    %c0_1 = arith.constant 0 : index
    %c0_2 = arith.constant 0 : index
    %1 = vector.load %arg2[%c0_1, %c0_2] : memref<4x16xf32, #tpu.memory_space<vmem>>, vector<4x16xf32>
    %c0_3 = arith.constant 0 : index
    %c0_4 = arith.constant 0 : index
    %2 = vector.load %arg3[%c0_3, %c0_4] : memref<4x16xf32, #tpu.memory_space<vmem>>, vector<4x16xf32>
    %3 = arith.subf %1, %0 : vector<4x16xf32>
    %4 = math.absf %3 : vector<4x16xf32>
    %cst = arith.constant 0.000000e+00 : f32
    %5 = vector.broadcast %cst : f32 to vector<4x16xf32>
    %6 = arith.subf %5, %4 : vector<4x16xf32>
    %7 = math.exp %6 : vector<4x16xf32>
    %cst_5 = arith.constant 1.000000e+00 : f32
    %8 = vector.broadcast %cst_5 : f32 to vector<4x16xf32>
    %9 = arith.addf %8, %7 : vector<4x16xf32>
    %10 = math.log %9 : vector<4x16xf32>
    %11 = tpu.iota {dimensions = array<i32: 0>} : vector<4x1xi32>
    %c2_i32 = arith.constant 2 : i32
    %12 = vector.broadcast %c2_i32 : i32 to vector<4x1xi32>
    %13 = arith.cmpi slt, %11, %12 : vector<4x1xi32>
    %cst_6 = arith.constant 0.000000e+00 : f32
    %14 = vector.broadcast %cst_6 : f32 to vector<4x16xf32>
    %15 = arith.subf %14, %3 : vector<4x16xf32>
    %16 = vector.shape_cast %13 : vector<4x1xi1> to vector<4x1xi1>
    %17 = vector.broadcast %16 : vector<4x1xi1> to vector<4x16xi1>
    %18 = arith.select %17, %15, %3 : vector<4x16xi1>, vector<4x16xf32>
    %cst_7 = arith.constant 0.000000e+00 : f32
    %19 = vector.broadcast %cst_7 : f32 to vector<4x16xf32>
    %20 = arith.maximumf %18, %19 : vector<4x16xf32>
    %21 = arith.addf %20, %10 : vector<4x16xf32>
    %cst_8 = arith.constant dense<0xFF800000> : vector<16xf32>
    %22 = vector.multi_reduction <maximumf>, %1, %cst_8 [0] : vector<4x16xf32> to vector<16xf32>
    %23 = vector.shape_cast %22 : vector<16xf32> to vector<1x16xf32>
    %24 = vector.broadcast %23 : vector<1x16xf32> to vector<4x16xf32>
    %25 = arith.subf %1, %24 : vector<4x16xf32>
    %26 = math.exp %25 : vector<4x16xf32>
    %cst_9 = arith.constant dense<0.000000e+00> : vector<16xf32>
    %27 = vector.multi_reduction <add>, %26, %cst_9 [0] : vector<4x16xf32> to vector<16xf32>
    %28 = vector.shape_cast %27 : vector<16xf32> to vector<1x16xf32>
    %29 = math.log %28 : vector<1x16xf32>
    %30 = arith.addf %23, %29 : vector<1x16xf32>
    %31 = vector.broadcast %30 : vector<1x16xf32> to vector<4x16xf32>
    %32 = arith.subf %31, %1 : vector<4x16xf32>
    %cst_10 = arith.constant dense<0xFF800000> : vector<16xf32>
    %33 = vector.multi_reduction <maximumf>, %0, %cst_10 [0] : vector<4x16xf32> to vector<16xf32>
    %34 = vector.shape_cast %33 : vector<16xf32> to vector<1x16xf32>
    %35 = vector.broadcast %34 : vector<1x16xf32> to vector<4x16xf32>
    %36 = arith.subf %0, %35 : vector<4x16xf32>
    %37 = math.exp %36 : vector<4x16xf32>
    %cst_11 = arith.constant dense<0.000000e+00> : vector<16xf32>
    %38 = vector.multi_reduction <add>, %37, %cst_11 [0] : vector<4x16xf32> to vector<16xf32>
    %39 = vector.shape_cast %38 : vector<16xf32> to vector<1x16xf32>
    %40 = math.log %39 : vector<1x16xf32>
    %41 = arith.addf %34, %40 : vector<1x16xf32>
    %42 = vector.broadcast %41 : vector<1x16xf32> to vector<4x16xf32>
    %43 = arith.subf %42, %0 : vector<4x16xf32>
    %44 = vector.shape_cast %13 : vector<4x1xi1> to vector<4x1xi1>
    %45 = vector.broadcast %44 : vector<4x1xi1> to vector<4x16xi1>
    %46 = arith.select %45, %32, %43 : vector<4x16xi1>, vector<4x16xf32>
    %cst_12 = arith.constant 7.500000e-01 : f32
    %47 = vector.broadcast %cst_12 : f32 to vector<4x16xf32>
    %48 = arith.mulf %47, %21 : vector<4x16xf32>
    %cst_13 = arith.constant 2.500000e-01 : f32
    %49 = vector.broadcast %cst_13 : f32 to vector<4x16xf32>
    %50 = arith.mulf %49, %46 : vector<4x16xf32>
    %51 = arith.addf %48, %50 : vector<4x16xf32>
    %52 = arith.mulf %2, %51 : vector<4x16xf32>
    %c0_14 = arith.constant 0 : index
    %c0_15 = arith.constant 0 : index
    %53 = vector.load %arg4[%c0_14, %c0_15] : memref<4x16xf32, #tpu.memory_space<vmem>>, vector<4x16xf32>
    tpu.vector_store %arg4[%c0_14, %c0_15], %52 {strides = array<i32>} : memref<4x16xf32, #tpu.memory_space<vmem>>, vector<4x16xf32>,
    %c0_16 = arith.constant 0 : index
    %c0_17 = arith.constant 0 : index
    %54 = vector.load %arg5[%c0_16, %c0_17] : memref<4x16xf32, #tpu.memory_space<vmem>>, vector<4x16xf32>
    tpu.vector_store %arg5[%c0_16, %c0_17], %21 {strides = array<i32>} : memref<4x16xf32, #tpu.memory_space<vmem>>, vector<4x16xf32>,
    %c0_18 = arith.constant 0 : index
    %c0_19 = arith.constant 0 : index
    %55 = vector.load %arg6[%c0_18, %c0_19] : memref<4x16xf32, #tpu.memory_space<vmem>>, vector<4x16xf32>
    tpu.vector_store %arg6[%c0_18, %c0_19], %46 {strides = array<i32>} : memref<4x16xf32, #tpu.memory_space<vmem>>, vector<4x16xf32>,
    %cst_20 = arith.constant dense<0xFF800000> : vector<16xf32>
    %56 = vector.multi_reduction <maximumf>, %3, %cst_20 [0] : vector<4x16xf32> to vector<16xf32>
    %57 = vector.shape_cast %56 : vector<16xf32> to vector<1x16xf32>
    %cst_21 = arith.constant dense<0x7F800000> : vector<16xf32>
    %58 = vector.multi_reduction <minimumf>, %3, %cst_21 [0] : vector<4x16xf32> to vector<16xf32>
    %59 = vector.shape_cast %58 : vector<16xf32> to vector<1x16xf32>
    %cst_22 = arith.constant 0.000000e+00 : f32
    %60 = vector.broadcast %cst_22 : f32 to vector<1x16xf32>
    %61 = arith.subf %60, %57 : vector<1x16xf32>
    %62 = math.exp %61 : vector<1x16xf32>
    %cst_23 = arith.constant 1.000000e+00 : f32
    %63 = vector.broadcast %cst_23 : f32 to vector<1x16xf32>
    %64 = arith.addf %63, %62 : vector<1x16xf32>
    %cst_24 = arith.constant 1.000000e+00 : f32
    %65 = vector.broadcast %cst_24 : f32 to vector<1x16xf32>
    %66 = arith.divf %65, %64 : vector<1x16xf32>
    %cst_25 = arith.constant 0.000000e+00 : f32
    %67 = vector.broadcast %cst_25 : f32 to vector<1x16xf32>
    %68 = arith.subf %67, %59 : vector<1x16xf32>
    %69 = math.exp %68 : vector<1x16xf32>
    %cst_26 = arith.constant 1.000000e+00 : f32
    %70 = vector.broadcast %cst_26 : f32 to vector<1x16xf32>
    %71 = arith.addf %70, %69 : vector<1x16xf32>
    %cst_27 = arith.constant 1.000000e+00 : f32
    %72 = vector.broadcast %cst_27 : f32 to vector<1x16xf32>
    %73 = arith.divf %72, %71 : vector<1x16xf32>
    %74 = tpu.concatenate %66, %73 in 0 : vector<1x16xf32>, vector<1x16xf32> -> vector<2x16xf32>
    %c0_28 = arith.constant 0 : index
    %c0_29 = arith.constant 0 : index
    %75 = vector.load %arg7[%c0_28, %c0_29] : memref<2x16xf32, #tpu.memory_space<vmem>>, vector<2x16xf32>
    tpu.vector_store %arg7[%c0_28, %c0_29], %74 {strides = array<i32>} : memref<2x16xf32, #tpu.memory_space<vmem>>, vector<2x16xf32>,
    return
  }
  func.func @transform_0(%arg0: i32) -> (i32, i32) {
    %c0_i32 = arith.constant 0 : i32
    %c0_i32_0 = arith.constant 0 : i32
    return %c0_i32, %arg0 : i32, i32
  }
  func.func @transform_1(%arg0: i32) -> (i32, i32) {
    %c0_i32 = arith.constant 0 : i32
    %c0_i32_0 = arith.constant 0 : i32
    return %c0_i32, %arg0 : i32, i32
  }
  func.func @transform_2(%arg0: i32) -> (i32, i32) {
    %c0_i32 = arith.constant 0 : i32
    %c0_i32_0 = arith.constant 0 : i32
    return %c0_i32, %arg0 : i32, i32
  }
  func.func @transform_3(%arg0: i32) -> (i32, i32) {
    %c0_i32 = arith.constant 0 : i32
    %c0_i32_0 = arith.constant 0 : i32
    return %c0_i32, %arg0 : i32, i32
  }
  func.func @transform_4(%arg0: i32) -> (i32, i32) {
    %c0_i32 = arith.constant 0 : i32
    %c0_i32_0 = arith.constant 0 : i32
    return %c0_i32, %arg0 : i32, i32
  }
  func.func @transform_5(%arg0: i32) -> (i32, i32) {
    %c0_i32 = arith.constant 0 : i32
    %c0_i32_0 = arith.constant 0 : i32
    return %c0_i32, %arg0 : i32, i32
  }
  func.func @transform_6(%arg0: i32) -> (i32, i32) {
    %c0_i32 = arith.constant 0 : i32
    %c0_i32_0 = arith.constant 0 : i32
    return %c0_i32, %arg0 : i32, i32
  }
}

</mosaic_0001>

<bundles_post_ra>
// kernel: tpu_custom_call.1
= control target key start
LH: loop header
LB: loop body
LE: loop exit
PB: predicated region body
PF: predicated region fallthrough
CT: control target
= control target key end

     0   :  { %12 = vsyncpa [#allocation3], 0  ;;  %s523_s0 = inlined_call_operand.hbm [shape: f32[4,16], index: 0, kind: input, shape index: {}]   ;;  %s524_s1 = inlined_call_operand.hbm [shape: f32[4,16], index: 1, kind: input, shape index: {}]   ;;  %s525_s2 = inlined_call_operand.vmem [shape: f32[4,16], index: 2, kind: input, shape index: {}]   ;;  %s526_s3 = inlined_call_operand.hbm [shape: f32[4,16], index: 3, kind: output, shape index: {0}]   ;;  %s527_s4 = inlined_call_operand.hbm [shape: f32[4,16], index: 4, kind: output, shape index: {1}]   ;;  %s528_s5 = inlined_call_operand.hbm [shape: f32[4,16], index: 5, kind: output, shape index: {2}]   ;;  %s529_s6 = inlined_call_operand.hbm [shape: f32[2,16], index: 6, kind: output, shape index: {3}]  }
   0x1   :  { %13 = vsyncpa [#allocation6], 0 }
   0x2   :  { %14 = vsyncpa [#allocation4], 0 }
   0x3   :  { %15 = vsyncpa [#allocation9], 0 }
   0x4   :  { %16 = vsyncpa [#allocation12], 0  ;;  %s371_s21 = smov [#allocation2]   ;;  %s372_s23 = smov [#allocation5]  }
   0x5   :  { %s23_s22 = sshll.u32 %s371_s21, 4  ;;  %s33_s24 = sshll.u32 %s372_s23, 4  ;;  %s24_s22 = int_to_ptr.vmem [resolvable:$true] %s23_s22  ;;  %s34_s24 = int_to_ptr.vmem [resolvable:$true] %s33_s24 }
   0x6   :  { %s229_s27 = scalar_lea.hbm %s523_s0, 64 }
   0x7   :  { %p230_p0 = scmp.ne.s32.totalorder %s523_s0, %s229_s27  ;;  %p233_p1 = scmp.lt.u32.totalorder %s229_s27, %s523_s0 }
   0x9   :  { %p235_p2 = pnand %p233_p1, %p230_p0 }
   0xb   :  { %238 = shalt.err (!%p235_p2)
}
   0xc   :  { %s239_s8 = scalar_lea.vmem %s24_s22, 64  ;;  %p244_p4 = scmp.lt.s32.totalorder %s24_s22, %s24_s22 }
   0xd   :  { %p240_p3 = scmp.ne.s32.totalorder %s24_s22, %s239_s8  ;;  %p245_p5 = scmp.lt.s32.totalorder %s239_s8, %s239_s8 }
   0xf   :  { %p246_p6 = por %p245_p5, %p244_p4 }
  0x11   :  { %p247_p7 = pnand %p246_p6, %p240_p3 }
  0x13   :  { %250 = shalt.err (!%p247_p7)
}
  0x14   :  { %26 = dma.hbm_to_vmem [thread:$0]  %s523_s0, 64, %s24_s22, [#allocation3]  }
  0x15   :  { %s251_s13 = scalar_lea.hbm %s524_s1, 64 }
  0x16   :  { %p252_p8 = scmp.ne.s32.totalorder %s524_s1, %s251_s13  ;;  %p255_p9 = scmp.lt.u32.totalorder %s251_s13, %s524_s1 }
  0x18   :  { %p257_p10 = pnand %p255_p9, %p252_p8 }
  0x1a   :  { %260 = shalt.err (!%p257_p10)
}
  0x1b   :  { %s261_s18 = scalar_lea.vmem %s34_s24, 64  ;;  %p266_p12 = scmp.lt.s32.totalorder %s34_s24, %s34_s24 }
  0x1c   :  { %p262_p11 = scmp.ne.s32.totalorder %s34_s24, %s261_s18  ;;  %p267_p13 = scmp.lt.s32.totalorder %s261_s18, %s261_s18 }
  0x1e   :  { %p268_p0 = por %p267_p13, %p266_p12 }
  0x20   :  { %p269_p1 = pnand %p268_p0, %p262_p11 }
  0x22   :  { %272 = shalt.err (!%p269_p1)
}
  0x23   :  { %36 = dma.hbm_to_vmem [thread:$0]  %s524_s1, 64, %s34_s24, [#allocation6]  }
  0x24   :  { %361 = dma.done.wait [#allocation3], 64  }
  0x25   :  { %362 = vsyncadd [#allocation3], 4294967232 }
  0x26   :  { %363 = dma.done.wait [#allocation6], 64  }
  0x27   :  { %364 = vsyncadd [#allocation6], 4294967232  ;;  %vm65_vm0 = vcmask 125952   ;;  %v436_v0 = vld [vmem:[#allocation2] sm:$0xf]  ;;  %v56_v39 = vlaneseq  ;;  %s373_s1 = smov [#allocation8]  }
  0x28   :  { %v438_v1 = vld [vmem:[#allocation5] sm:$0xf]  ;;  %v87_v4 = vsel %vm65_vm0, %v436_v0, -inf  ;;  %s162_s20 = sshll.u32 %s373_s1, 4  ;;  %s163_s20 = int_to_ptr.vmem [resolvable:$true] %s162_s20 }
  0x29   :  { %v48_v2 = vsub.f32 %v438_v1, %v436_v0  ;;  %v66_v3 = vsel %vm65_vm0, %v438_v1, -inf  ;;  %v88_v6 = vrot.slane %v87_v4, 4  ;;  %v456_v45 = vshrl.u32 %v56_v39, 7  ;;  %s273_s21 = scalar_lea.vmem %s163_s20, 64  ;;  %p278_p3 = scmp.lt.s32.totalorder %s163_s20, %s163_s20 }
  0x2a   :  { %v67_v5 = vrot.slane %v66_v3, 4  ;;  %p274_p2 = scmp.ne.s32.totalorder %s163_s20, %s273_s21  ;;  %p279_p4 = scmp.lt.s32.totalorder %s273_s21, %s273_s21 }
  0x2b   :  { %v49_v7 = vand.u32 2147483647, %v48_v2  ;;  %v116_v8 = vsel %vm65_vm0, %v48_v2, -inf  ;;  %v123_v9 = vsel %vm65_vm0, %v48_v2, inf  ;;  %v89_v13 = vmax.f32 %v87_v4, %v88_v6 }
  0x2c   :  { %v117_v10 = vrot.slane %v116_v8, 4  ;;  %v124_v11 = vrot.slane %v123_v9, 4  ;;  %v68_v12 = vmax.f32 %v66_v3, %v67_v5  ;;  %v59_v46 = vsub.f32 0.0, %v48_v2  ;;  %p280_p5 = por %p279_p4, %p278_p3 }
  0x2d   :  { %v50_v14 = vsub.f32 0.0, %v49_v7  ;;  %v90_v19 = vrot.slane %v89_v13, 2  ;;  %vm58_vm1 = vcmp.lt.s32.totalorder %v456_v45, 2 }
  0x2e   :  { %v118_v15 = vmax.f32 %v116_v8, %v117_v10  ;;  %v125_v16 = vmin.f32 %v123_v9, %v124_v11  ;;  %v69_v17 = vrot.slane %v68_v12, 2  ;;  %v62_v48 = vsel %vm58_vm1, %v59_v46, %v48_v2  ;;  %p281_p6 = pnand %p280_p5, %p274_p2 }
  0x2f   :  { %v51_v18 = vmul.f32 1.442695, %v50_v14  ;;  %v91_v23 = vmax.f32 %v89_v13, %v90_v19  ;;  %v63_v55 = vmax.f32 %v62_v48, 0.0 }
  0x30   :  { %v119_v20 = vrot.slane %v118_v15, 2  ;;  %v126_v21 = vrot.slane %v125_v16, 2  ;;  %v70_v22 = vmax.f32 %v68_v12, %v69_v17 }
  0x31   :  { %209 = vpow2.f32 %v51_v18  ;;  %v92_v27 = vrot.slane %v91_v23, 1 }
  0x32   :  { %v71_v24 = vrot.slane %v70_v22, 1  ;;  %v120_v25 = vmax.f32 %v118_v15, %v119_v20  ;;  %v127_v26 = vmin.f32 %v125_v16, %v126_v21 }
  0x33   :  { %v450_v31 = vmax.f32 %v91_v23, %v92_v27 }
  0x34   :  { %v448_v28 = vmax.f32 %v70_v22, %v71_v24  ;;  %v121_v29 = vrot.slane %v120_v25, 1  ;;  %v128_v30 = vrot.slane %v127_v26, 1 }
  0x35   :  { %v94_v35 = vsub.f32 %v436_v0, %v450_v31 }
  0x36   :  { %v73_v32 = vsub.f32 %v438_v1, %v448_v28  ;;  %v122_v33 = vmax.f32 %v120_v25, %v121_v29  ;;  %v129_v34 = vmin.f32 %v127_v26, %v128_v30 }
  0x37   :  { %v95_v40 = vmul.f32 1.442695, %v94_v35 }
  0x38   :  { %v74_v36 = vmul.f32 1.442695, %v73_v32  ;;  %v130_v37 = vsub.f32 0.0, %v122_v33  ;;  %v136_v38 = vsub.f32 0.0, %v129_v34 }
  0x3a   :  { %211 = vpow2.f32 %v74_v36  ;;  %v131_v41 = vmul.f32 1.442695, %v130_v37  ;;  %v137_v42 = vmul.f32 1.442695, %v136_v38 }
  0x3b   :  { %v210_v43 = vpop.eup %209  ;;  %213 = vpow2.f32 %v95_v40 }
  0x3c   :  { %v53_v44 = vadd.f32 1.0, %v210_v43  ;;  %215 = vpow2.f32 %v131_v41 }
  0x3d   :  { %217 = vpow2.f32 %v137_v42 }
  0x3e   :  { %219 = vlog2.f32 %v53_v44 }
  0x44   :  { %v212_v47 = vpop.eup %211 }
  0x45   :  { %v214_v49 = vpop.eup %213  ;;  %v76_v50 = vsel %vm65_vm0, %v212_v47, 0.0 }
  0x46   :  { %v216_v51 = vpop.eup %215  ;;  %v77_v52 = vrot.slane %v76_v50, 4  ;;  %v97_v53 = vsel %vm65_vm0, %v214_v49, 0.0 }
  0x47   :  { %v218_v54 = vpop.eup %217  ;;  %v98_v56 = vrot.slane %v97_v53, 4  ;;  %v133_v57 = vadd.f32 1.0, %v216_v51 }
  0x48   :  { %v220_v58 = vpop.eup %219  ;;  %v78_v59 = vadd.f32 %v77_v52, %v76_v50  ;;  %v139_v60 = vadd.f32 1.0, %v218_v54 }
  0x49   :  { %v55_v61 = vmul.f32 0.6931472, %v220_v58  ;;  %v99_v62 = vadd.f32 %v98_v56, %v97_v53  ;;  %221 = vrcp.f32 %v133_v57 }
  0x4a   :  { %v79_v63 = vrot.slane %v78_v59, 2  ;;  %223 = vrcp.f32 %v139_v60 }
  0x4b   :  { %v64_v2 = vadd.f32 %v63_v55, %v55_v61  ;;  %v100_v3 = vrot.slane %v99_v62, 2 }
  0x4c   :  { %v80_v4 = vadd.f32 %v79_v63, %v78_v59 }
  0x4d   :  { %114 = vst.msk [vmem:[#allocation8] sm:$0xf] %vm65_vm0, %v64_v2  ;;  %v101_v5 = vadd.f32 %v100_v3, %v99_v62 }
  0x4e   :  { %v81_v6 = vrot.slane %v80_v4, 1 }
  0x4f   :  { %284 = shalt.err (!%p281_p6)
}
  0x50   :  { %s285_s24 = scalar_lea.hbm %s527_s4, 64 }
  0x51   :  { %p286_p7 = scmp.ne.s32.totalorder %s527_s4, %s285_s24  ;;  %p289_p8 = scmp.lt.u32.totalorder %s285_s24, %s527_s4 }
  0x53   :  { %p291_p9 = pnand %p289_p8, %p286_p7 }
  0x55   :  { %294 = shalt.err (!%p291_p9)
}
  0x56   :  { %165 = dma.vmem_to_hbm [thread:$0]  %s163_s20, 64, %s527_s4, [#allocation9]   ;;  %v102_v7 = vrot.slane %v101_v5, 1  ;;  %v82_v8 = vadd.f32 %v81_v6, %v80_v4  ;;  %vm142_vm2 = vcmask 1040384   ;;  %v222_v10 = vpop.eup %221  ;;  %vm144_vm3 = vcmask 123904  }
  0x57   :  { %s374_s7 = smov [#allocation11]   ;;  %v224_v11 = vpop.eup %223 }
  0x58   :  { %v103_v9 = vadd.f32 %v102_v7, %v101_v5  ;;  %s182_s8 = sshll.u32 %s374_s7, 4  ;;  %225 = vlog2.f32 %v82_v8  ;;  %v143_v12 = vsel %vm142_vm2, %v222_v10, %v224_v11  ;;  %s183_s8 = int_to_ptr.vmem [resolvable:$true] %s182_s8 }
  0x59   :  { %145 = vst.msk [vmem:[#allocation11] sm:$0x3] %vm144_vm3, %v143_v12  ;;  %s295_s9 = scalar_lea.vmem %s183_s8, 32  ;;  %p300_p11 = scmp.lt.s32.totalorder %s183_s8, %s183_s8 }
  0x5a   :  { %227 = vlog2.f32 %v103_v9  ;;  %p296_p10 = scmp.ne.s32.totalorder %s183_s8, %s295_s9  ;;  %p301_p12 = scmp.lt.s32.totalorder %s295_s9, %s295_s9 }
  0x5c   :  { %p302_p13 = por %p301_p12, %p300_p11 }
  0x5e   :  { %p303_p0 = pnand %p302_p13, %p296_p10 }
  0x60   :  { %306 = shalt.err (!%p303_p0)
}
  0x61   :  { %s307_s11 = scalar_lea.hbm %s529_s6, 32 }
  0x62   :  { %p308_p1 = scmp.ne.s32.totalorder %s529_s6, %s307_s11  ;;  %p311_p2 = scmp.lt.u32.totalorder %s307_s11, %s529_s6 }
  0x64   :  { %p313_p3 = pnand %p311_p2, %p308_p1 }
  0x66   :  { %316 = shalt.err (!%p313_p3)
}
  0x67   :  { %185 = dma.vmem_to_hbm [thread:$0]  %s183_s8, 32, %s529_s6, [#allocation12]   ;;  %v226_v13 = vpop.eup %225  ;;  %v109_v21 = vmul.f32 0.75, %v64_v2  ;;  %v47_v24 = vld [vmem:[%s525_s2] sm:$0xf] }
  0x68   :  { %v228_v14 = vpop.eup %227  ;;  %v84_v15 = vmul.f32 0.6931472, %v226_v13  ;;  %s375_s18 = smov [#allocation10]   ;;  %s376_s6 = smov [#allocation7]  }
  0x69   :  { %v105_v16 = vmul.f32 0.6931472, %v228_v14  ;;  %s172_s0 = sshll.u32 %s375_s18, 4  ;;  %s152_s19 = sshll.u32 %s376_s6, 4  ;;  %s173_s0 = int_to_ptr.vmem [resolvable:$true] %s172_s0  ;;  %s153_s19 = int_to_ptr.vmem [resolvable:$true] %s152_s19 }
  0x6a   :  { %v85_v17 = vadd.f32 %v84_v15, %v448_v28  ;;  %s317_s21 = scalar_lea.vmem %s173_s0, 64  ;;  %p322_p5 = scmp.lt.s32.totalorder %s173_s0, %s173_s0 }
  0x6b   :  { %v106_v18 = vadd.f32 %v105_v16, %v450_v31  ;;  %p318_p4 = scmp.ne.s32.totalorder %s173_s0, %s317_s21  ;;  %p323_p6 = scmp.lt.s32.totalorder %s317_s21, %s317_s21 }
  0x6c   :  { %v86_v19 = vsub.f32 %v85_v17, %v438_v1 }
  0x6d   :  { %v107_v20 = vsub.f32 %v106_v18, %v436_v0  ;;  %p324_p7 = por %p323_p6, %p322_p5 }
  0x6f   :  { %v108_v22 = vsel %vm58_vm1, %v86_v19, %v107_v20  ;;  %p325_p8 = pnand %p324_p7, %p318_p4 }
  0x70   :  { %v110_v23 = vmul.f32 0.25, %v108_v22  ;;  %115 = vst.msk [vmem:[#allocation10] sm:$0xf] %vm65_vm0, %v108_v22 }
  0x71   :  { %328 = shalt.err (!%p325_p8)
}
  0x72   :  { %s329_s24 = scalar_lea.hbm %s528_s5, 64 }
  0x73   :  { %p330_p9 = scmp.ne.s32.totalorder %s528_s5, %s329_s24  ;;  %p333_p10 = scmp.lt.u32.totalorder %s329_s24, %s528_s5 }
  0x75   :  { %p335_p11 = pnand %p333_p10, %p330_p9 }
  0x77   :  { %338 = shalt.err (!%p335_p11)
}
  0x78   :  { %175 = dma.vmem_to_hbm [thread:$0]  %s173_s0, 64, %s528_s5, [#allocation9]   ;;  %v111_v0 = vadd.f32 %v110_v23, %v109_v21 }
  0x79   :  { %s339_s30 = scalar_lea.vmem %s153_s19, 64  ;;  %p344_p13 = scmp.lt.s32.totalorder %s153_s19, %s153_s19 }
  0x7a   :  { %v112_v1 = vmul.f32 %v111_v0, %v47_v24  ;;  %p340_p12 = scmp.ne.s32.totalorder %s153_s19, %s339_s30  ;;  %p345_p0 = scmp.lt.s32.totalorder %s339_s30, %s339_s30 }
  0x7c   :  { %113 = vst.msk [vmem:[#allocation7] sm:$0xf] %vm65_vm0, %v112_v1  ;;  %p346_p1 = por %p345_p0, %p344_p13 }
  0x7e   :  { %p347_p2 = pnand %p346_p1, %p340_p12 }
  0x80   :  { %350 = shalt.err (!%p347_p2)
}
  0x81   :  { %s351_s9 = scalar_lea.hbm %s526_s3, 64 }
  0x82   :  { %p352_p3 = scmp.ne.s32.totalorder %s526_s3, %s351_s9  ;;  %p355_p4 = scmp.lt.u32.totalorder %s351_s9, %s526_s3 }
  0x84   :  { %p357_p5 = pnand %p355_p4, %p352_p3 }
  0x86   :  { %360 = shalt.err (!%p357_p5)
}
  0x87   :  { %155 = dma.vmem_to_hbm [thread:$0]  %s153_s19, 64, %s526_s3, [#allocation4]  }
  0x88   :  { %365 = dma.done.wait [#allocation4], 64  }
  0x89   :  { %366 = vsyncadd [#allocation4], 4294967232 }
  0x8a   :  { %367 = dma.done.wait [#allocation9], 128  }
  0x8b   :  { %368 = vsyncadd [#allocation9], 4294967168 }
  0x8c   :  { %369 = dma.done.wait [#allocation12], 32  }
  0x8d   :  { %370 = vsyncadd [#allocation12], 4294967264 }
  0x8e   :  { %198 = vsyncpa [#allocation3], 1 }
  0x8f   :  { %199 = vsyncpa [#allocation6], 1 }
  0x90   :  { %200 = vsyncpa [#allocation4], 1 }
  0x91   :  { %201 = vsyncpa [#allocation9], 1 }
  0x92   :  { %202 = vsyncpa [#allocation12], 1 }

</bundles_post_ra>
